<compile_context>
chip_gen: v7x
topology: tpu7x:2x2x1
jax: 0.10.0
libtpu: 0.0.40
codegen_flags: <defaults>
</compile_context>

<pallas_src>
import functools

import jax
import jax.numpy as jnp
from jax.experimental import pallas as pl
from jax.experimental.pallas import tpu as pltpu


def _round_up(x, m):
    return (x + m - 1) // m * m


def _lambda_kernel(h_ref, w_ref, b_ref, eps_ref, out_ref, *, zd, softplus, out_w):
    """Fused pass: s = h @ [Wm|Wv] + [bm|bv]; split; softplus; reparameterize.

    Packed output layout (width out_w = round_up(3*zd, 128)):
      cols [0, zd)       -> z       (eps * std + mean)
      cols [zd, 2*zd)    -> mean
      cols [2*zd, 3*zd)  -> logvar  (post-softplus if enabled)
      cols [3*zd, out_w) -> zero padding (sliced off in the wrapper)
    """
    h = h_ref[...]
    # Single MXU matmul for both heads (shared LHS), f32 accumulation.
    s = jnp.dot(h, w_ref[...], preferred_element_type=jnp.float32) + b_ref[...]
    mean = s[:, :zd]
    lv = s[:, zd:]
    if softplus:
        # Softplus(x) = log(1 + exp(x)), overflow-safe form.
        lv = jnp.maximum(lv, 0.0) + jnp.log(1.0 + jnp.exp(-jnp.abs(lv)))
    std = jnp.exp(0.5 * lv)
    z = eps_ref[...] * std + mean            # reparameterization trick

    pieces = [z, mean, lv]
    if out_w > 3 * zd:
        pieces.append(jnp.zeros((h.shape[0], out_w - 3 * zd), jnp.float32))
    # One full-width (lane-dense) store of the whole output tile.
    out_ref[...] = jnp.concatenate(pieces, axis=-1)


def lambda_forward(hidden, params, eps=None, *, key=None, softplus=True,
                   training=True, block_m=1024, use_bf16=False):
    """Pallas equivalent of Lambda.forward. Returns (z, mean, logvar).

    `hidden` is (B, hid); callers with per-timestep GRU states should fold the
    time axis into the batch so ONE launch covers everything (amortizes the
    pallas_call fixed cost and keeps the fused weights resident in VMEM).
    Training mode: eps may be passed explicitly (for testing) or generated from
    `key` (mirrors torch.randn_like).  Eval mode returns (mean, mean, logvar),
    exactly like the PyTorch module.
    """
    B, hid = hidden.shape
    w_cat, b_cat = params["w_cat"], params["b_cat"]
    zd = w_cat.shape[1] // 2

    if training and eps is None and key is not None:
        eps = jax.random.normal(key, (B, zd), jnp.float32)
    if (not training) or (eps is None):
        # eps == 0 makes z == mean exactly, matching eval semantics.
        eps = jnp.zeros((B, zd), jnp.float32)

    # Batch block: multiple of 8 sublanes; capped so double-buffered blocks are
    # a few hundred KiB at most -- far under VMEM on every TPU generation, yet
    # large enough to hide per-step DMA overhead once batched.
    blk = min(block_m, _round_up(B, 8))
    Bp = _round_up(B, blk)
    if Bp != B:
        hidden = jnp.pad(hidden, ((0, Bp - B), (0, 0)))
        eps = jnp.pad(eps, ((0, Bp - B), (0, 0)))

    if use_bf16:
        # Only worthwhile once the folded batch is >= ~256 rows (native bf16
        # MXU); accumulation stays f32 via preferred_element_type.
        hidden = hidden.astype(jnp.bfloat16)
        w_cat = w_cat.astype(jnp.bfloat16)

    out_w = _round_up(3 * zd, 128)           # lane-dense packed output width
    grid = (Bp // blk,)

    kern = functools.partial(_lambda_kernel, zd=zd, softplus=softplus, out_w=out_w)

    packed = pl.pallas_call(
        kern,
        out_shape=jax.ShapeDtypeStruct((Bp, out_w), jnp.float32),
        grid_spec=pltpu.PrefetchScalarGridSpec(
            num_scalar_prefetch=0,
            grid=grid,
            in_specs=[
                pl.BlockSpec((blk, hid), lambda i: (i, 0)),      # hidden: blocked on batch
                pl.BlockSpec((hid, 2 * zd), lambda i: (0, 0)),   # fused weights: resident
                pl.BlockSpec((1, 2 * zd), lambda i: (0, 0)),     # fused bias: resident
                pl.BlockSpec((blk, zd), lambda i: (i, 0)),       # eps: blocked on batch
            ],
            out_specs=pl.BlockSpec((blk, out_w), lambda i: (i, 0)),
        ),
        compiler_params=pltpu.CompilerParams(
            dimension_semantics=("parallel",)),                  # shards batch over v7x TCs
    )(hidden, w_cat, b_cat, eps)

    z = packed[:B, 0:zd]
    mean = packed[:B, zd:2 * zd]
    logvar = packed[:B, 2 * zd:3 * zd]
    if training:
        return z, mean, logvar
    return mean, mean, logvar


def init_lambda_params(key, zdims, hidden_size_layer_1):
    """nn.Linear-style init, stored fused: W_cat = [Wm | Wv] of shape (hid, 2*zdims)."""
    hid_dim = hidden_size_layer_1 * 4
    k1, k2, k3, k4 = jax.random.split(key, 4)
    bound = 1.0 / jnp.sqrt(hid_dim)
    wm = jax.random.uniform(k1, (hid_dim, zdims), jnp.float32, -bound, bound)
    bm = jax.random.uniform(k2, (1, zdims), jnp.float32, -bound, bound)
    wv = jax.random.uniform(k3, (hid_dim, zdims), jnp.float32, -bound, bound)
    bv = jax.random.uniform(k4, (1, zdims), jnp.float32, -bound, bound)
    return {
        "w_cat": jnp.concatenate([wm, wv], axis=1),   # (hid, 2*zdims)
        "b_cat": jnp.concatenate([bm, bv], axis=1),   # (1, 2*zdims)
    }


def _softplus_ref(x):
    return jnp.maximum(x, 0.0) + jnp.log1p(jnp.exp(-jnp.abs(x)))


if __name__ == "__main__":
    key = jax.random.PRNGKey(0)
    k_param, k_h1, k_e1, k_h2, k_e2 = jax.random.split(key, 5)

    ZDIMS = 32
    hidden_size_layer_1 = 32            # -> hid_dim = 128
    hid_dim = hidden_size_layer_1 * 4

    params = init_lambda_params(k_param, ZDIMS, hidden_size_layer_1)
    wm = params["w_cat"][:, :ZDIMS]
    wv = params["w_cat"][:, ZDIMS:]
    bm = params["b_cat"][:, :ZDIMS]
    bv = params["b_cat"][:, ZDIMS:]

    # --- Case 1: single small batch (grid of 1) -------------------------------
    B1 = 8
    hidden1 = jax.random.normal(k_h1, (B1, hid_dim), jnp.float32)
    eps1 = jax.random.normal(k_e1, (B1, ZDIMS), jnp.float32)

    z1, mean1, lv1 = lambda_forward(hidden1, params, eps1, softplus=True, training=True)
    jax.block_until_ready((z1, mean1, lv1))

    ref_mean1 = hidden1 @ wm + bm
    ref_lv1 = _softplus_ref(hidden1 @ wv + bv)
    ref_z1 = eps1 * jnp.exp(0.5 * ref_lv1) + ref_mean1
    assert jnp.allclose(mean1, ref_mean1, atol=1e-4)
    assert jnp.allclose(lv1, ref_lv1, atol=1e-4)
    assert jnp.allclose(z1, ref_z1, atol=1e-4)

    # --- Case 2: time-folded batch exercising the grid + row padding ----------
    B2 = 300                              # e.g. T * batch folded; not a multiple of the block
    hidden2 = jax.random.normal(k_h2, (B2, hid_dim), jnp.float32)
    eps2 = jax.random.normal(k_e2, (B2, ZDIMS), jnp.float32)

    z2, mean2, lv2 = lambda_forward(hidden2, params, eps2, softplus=True,
                                    training=True, block_m=128)   # grid = 3 blocks
    jax.block_until_ready((z2, mean2, lv2))

    ref_mean2 = hidden2 @ wm + bm
    ref_lv2 = _softplus_ref(hidden2 @ wv + bv)
    ref_z2 = eps2 * jnp.exp(0.5 * ref_lv2) + ref_mean2
    assert jnp.allclose(mean2, ref_mean2, atol=1e-4)
    assert jnp.allclose(lv2, ref_lv2, atol=1e-4)
    assert jnp.allclose(z2, ref_z2, atol=1e-4)

    # --- Eval mode: returns (mean, mean, logvar), matching the PyTorch module --
    z_e, mean_e, lv_e = lambda_forward(hidden1, params, softplus=True, training=False)
    jax.block_until_ready((z_e, mean_e, lv_e))
    assert jnp.allclose(z_e, mean_e)
    assert jnp.allclose(mean_e, ref_mean1, atol=1e-4)
    assert jnp.allclose(lv_e, ref_lv1, atol=1e-4)

    # --- Training mode with internally generated eps (torch.randn_like path) ---
    z_k, mean_k, lv_k = lambda_forward(hidden1, params, key=k_e2, softplus=True,
                                       training=True)
    jax.block_until_ready((z_k, mean_k, lv_k))
    assert jnp.allclose(mean_k, ref_mean1, atol=1e-4)
    assert jnp.allclose(lv_k, ref_lv1, atol=1e-4)

    # --- softplus=False path ----------------------------------------------------
    z_n, mean_n, lv_n = lambda_forward(hidden1, params, eps1, softplus=False, training=True)
    jax.block_until_ready((z_n, mean_n, lv_n))
    assert jnp.allclose(lv_n, hidden1 @ wv + bv, atol=1e-4)

    print("KERNEL_OK")
</pallas_src>

<mosaic_0001>
module attributes {stable_mosaic.version = 11 : i64} {
  func.func @_lambda_kernel(%arg0: i32, %arg1: memref<8x128xf32, #tpu.memory_space<vmem>>, %arg2: memref<128x64xf32, #tpu.memory_space<vmem>>, %arg3: memref<1x64xf32, #tpu.memory_space<vmem>>, %arg4: memref<8x32xf32, #tpu.memory_space<vmem>>, %arg5: memref<8x128xf32, #tpu.memory_space<vmem>>) attributes {dimension_semantics = [#tpu.dimension_semantics<parallel>], iteration_bounds = array<i64: 1>, scalar_prefetch = 0 : i64, scratch_operands = 0 : i64, tpu.core_type = #tpu.core_type<tc>, window_params = [{transform_indices = @transform_0, window_bounds = array<i64: 8, 128>}, {pipeline_mode = #tpu.pipeline_mode<synchronous>, transform_indices = @transform_1, window_bounds = array<i64: 128, 64>}, {pipeline_mode = #tpu.pipeline_mode<synchronous>, transform_indices = @transform_2, window_bounds = array<i64: 1, 64>}, {transform_indices = @transform_3, window_bounds = array<i64: 8, 32>}, {transform_indices = @transform_4, window_bounds = array<i64: 8, 128>}]} {
    %c0 = arith.constant 0 : index
    %c0_0 = arith.constant 0 : index
    %0 = vector.load %arg1[%c0, %c0_0] : memref<8x128xf32, #tpu.memory_space<vmem>>, vector<8x128xf32>
    %c0_1 = arith.constant 0 : index
    %c0_2 = arith.constant 0 : index
    %1 = vector.load %arg2[%c0_1, %c0_2] : memref<128x64xf32, #tpu.memory_space<vmem>>, vector<128x64xf32>
    %cst = arith.constant dense<0.000000e+00> : vector<8x64xf32>
    %2 = tpu.matmul %0, %1, %cst {dimension_numbers = #tpu.dot_dimension_numbers<[1], [0], [0], [1], [0, 0, 1, 1], [], []>} : vector<8x128xf32>, vector<128x64xf32>, vector<8x64xf32> -> vector<8x64xf32>
    %c0_3 = arith.constant 0 : index
    %c0_4 = arith.constant 0 : index
    %3 = vector.load %arg3[%c0_3, %c0_4] : memref<1x64xf32, #tpu.memory_space<vmem>>, vector<1x64xf32>
    %4 = vector.broadcast %3 : vector<1x64xf32> to vector<8x64xf32>
    %5 = arith.addf %2, %4 : vector<8x64xf32>
    %6 = vector.extract_strided_slice %5 {offsets = [0, 0], sizes = [8, 32], strides = [1, 1]} : vector<8x64xf32> to vector<8x32xf32>
    %7 = vector.extract_strided_slice %5 {offsets = [0, 32], sizes = [8, 32], strides = [1, 1]} : vector<8x64xf32> to vector<8x32xf32>
    %cst_5 = arith.constant 0.000000e+00 : f32
    %8 = vector.broadcast %cst_5 : f32 to vector<8x32xf32>
    %9 = arith.maximumf %7, %8 : vector<8x32xf32>
    %10 = math.absf %7 : vector<8x32xf32>
    %cst_6 = arith.constant 0.000000e+00 : f32
    %11 = vector.broadcast %cst_6 : f32 to vector<8x32xf32>
    %12 = arith.subf %11, %10 : vector<8x32xf32>
    %13 = math.exp %12 : vector<8x32xf32>
    %cst_7 = arith.constant 1.000000e+00 : f32
    %14 = vector.broadcast %cst_7 : f32 to vector<8x32xf32>
    %15 = arith.addf %14, %13 : vector<8x32xf32>
    %16 = math.log %15 : vector<8x32xf32>
    %17 = arith.addf %9, %16 : vector<8x32xf32>
    %cst_8 = arith.constant 5.000000e-01 : f32
    %18 = vector.broadcast %cst_8 : f32 to vector<8x32xf32>
    %19 = arith.mulf %18, %17 : vector<8x32xf32>
    %20 = math.exp %19 : vector<8x32xf32>
    %c0_9 = arith.constant 0 : index
    %c0_10 = arith.constant 0 : index
    %21 = vector.load %arg4[%c0_9, %c0_10] : memref<8x32xf32, #tpu.memory_space<vmem>>, vector<8x32xf32>
    %22 = arith.mulf %21, %20 : vector<8x32xf32>
    %23 = arith.addf %22, %6 : vector<8x32xf32>
    %cst_11 = arith.constant 0.000000e+00 : f32
    %24 = vector.broadcast %cst_11 : f32 to vector<8x32xf32>
    %25 = tpu.concatenate %23, %6, %17, %24 in 1 : vector<8x32xf32>, vector<8x32xf32>, vector<8x32xf32>, vector<8x32xf32> -> vector<8x128xf32>
    %c0_12 = arith.constant 0 : index
    %c0_13 = arith.constant 0 : index
    %26 = vector.load %arg5[%c0_12, %c0_13] : memref<8x128xf32, #tpu.memory_space<vmem>>, vector<8x128xf32>
    tpu.vector_store %arg5[%c0_12, %c0_13], %25 {strides = array<i32>} : memref<8x128xf32, #tpu.memory_space<vmem>>, vector<8x128xf32>,
    return
  }
  func.func @transform_0(%arg0: i32) -> (i32, i32) {
    %c0_i32 = arith.constant 0 : i32
    %c0_i32_0 = arith.constant 0 : i32
    return %arg0, %c0_i32 : i32, i32
  }
  func.func @transform_1(%arg0: i32) -> (i32, i32) {
    %c0_i32 = arith.constant 0 : i32
    %c0_i32_0 = arith.constant 0 : i32
    %c0_i32_1 = arith.constant 0 : i32
    return %c0_i32, %c0_i32_0 : i32, i32
  }
  func.func @transform_2(%arg0: i32) -> (i32, i32) {
    %c0_i32 = arith.constant 0 : i32
    %c0_i32_0 = arith.constant 0 : i32
    %c0_i32_1 = arith.constant 0 : i32
    return %c0_i32, %c0_i32_0 : i32, i32
  }
  func.func @transform_3(%arg0: i32) -> (i32, i32) {
    %c0_i32 = arith.constant 0 : i32
    %c0_i32_0 = arith.constant 0 : i32
    return %arg0, %c0_i32 : i32, i32
  }
  func.func @transform_4(%arg0: i32) -> (i32, i32) {
    %c0_i32 = arith.constant 0 : i32
    %c0_i32_0 = arith.constant 0 : i32
    return %arg0, %c0_i32 : i32, i32
  }
}

</mosaic_0001>

<bundles_post_ra>
// kernel: tpu_custom_call.1
= control target key start
LH: loop header
LB: loop body
LE: loop exit
PB: predicated region body
PF: predicated region fallthrough
CT: control target
= control target key end

     0   :  { %v273_v3 = vmov 0.0|0.0   ;;  %vm274_vm0 = vmmov 0   ;;  %v275_v6 = vmov 0.0   ;;  %s373_s0 = inlined_call_operand.vmem [shape: f32[8,128], index: 0, kind: input, shape index: {}]   ;;  %s374_s1 = inlined_call_operand.vmem [shape: f32[128,64], index: 1, kind: input, shape index: {}]   ;;  %s375_s2 = inlined_call_operand.vmem [shape: f32[1,64], index: 2, kind: input, shape index: {}]   ;;  %s376_s3 = inlined_call_operand.vmem [shape: f32[8,32], index: 3, kind: input, shape index: {}]   ;;  %s377_s4 = inlined_call_operand.hbm [shape: f32[8,128], index: 4, kind: output, shape index: {}]  }
   0x1   :  { %v19_v0 = vld [vmem:[%s374_s1] sm:$0xff]  ;;  %v20_v1 = vld [vmem:[%s374_s1 + $0x8] sm:$0xff]  ;;  %v21_v2 = vld [vmem:[%s374_s1 + $0x10] sm:$0xff]  ;;  %213 = vmatprep.subr.bf16.mxu0 %v273_v3  ;;  %210 = vmatprep.mubr.msk.f32.mxu0 %vm274_vm0, %v275_v6 }
   0x2   :  { %v214_v4 = vpack.c.bf16 %v20_v1, %v19_v0  ;;  %v22_v5 = vld [vmem:[%s374_s1 + $0x18] sm:$0xff]  ;;  %v23_v8 = vld [vmem:[%s374_s1 + $0x20] sm:$0xff]  ;;  %v24_v9 = vld [vmem:[%s374_s1 + $0x28] sm:$0xff] }
   0x3   :  { %v217_v7 = vpack.c.bf16 %v22_v5, %v21_v2 }
   0x4   :  { %215 = vmatpush3.bf16.msra.mxu0 %v214_v4 }
   0x5   :  { %216 = vmatprep.subr.bf16.mxu0 %v273_v3 }
   0x6   :  { %9 = vsyncpa [#allocation3], 0  ;;  %v220_v10 = vpack.c.bf16 %v24_v9, %v23_v8  ;;  %v25_v11 = vld [vmem:[%s374_s1 + $0x30] sm:$0xff]  ;;  %v26_v12 = vld [vmem:[%s374_s1 + $0x38] sm:$0xff]  ;;  %vm139_vm1 = vcmask 261120   ;;  %vm141_vm2 = vcmask 523264  }
   0x7   :  { %v223_v13 = vpack.c.bf16 %v26_v12, %v25_v11  ;;  %v27_v14 = vld [vmem:[%s374_s1 + $0x40] sm:$0xff]  ;;  %v28_v15 = vld [vmem:[%s374_s1 + $0x48] sm:$0xff]  ;;  %v29_v17 = vld [vmem:[%s374_s1 + $0x50] sm:$0xff]  ;;  %s278_s26 = smov [#allocation2]   ;;  %vm143_vm3 = vcmask 785408  }
   0x8   :  { %218 = vmatpush3.bf16.msra.mxu0 %v217_v7  ;;  %v226_v16 = vpack.c.bf16 %v28_v15, %v27_v14  ;;  %v30_v18 = vld [vmem:[%s374_s1 + $0x58] sm:$0xff]  ;;  %v31_v20 = vld [vmem:[%s374_s1 + $0x60] sm:$0xff]  ;;  %v32_v21 = vld [vmem:[%s374_s1 + $0x68] sm:$0xff]  ;;  %s152_s27 = sshll.u32 %s278_s26, 4  ;;  %s153_s27 = int_to_ptr.vmem [resolvable:$true] %s152_s27 }
   0x9   :  { %219 = vmatprep.subr.bf16.mxu0 %v273_v3  ;;  %v229_v19 = vpack.c.bf16 %v30_v18, %v29_v17  ;;  %v232_v22 = vpack.c.bf16 %v32_v21, %v31_v20  ;;  %v33_v23 = vld [vmem:[%s374_s1 + $0x70] sm:$0xff]  ;;  %v34_v24 = vld [vmem:[%s374_s1 + $0x78] sm:$0xff]  ;;  %v18_v26 = vld [vmem:[%s373_s0] sm:$0xff]  ;;  %s276_s0 = smov 32   ;;  %s277_s1 = smov 96  }
   0xa   :  { %v235_v25 = vpack.c.bf16 %v34_v24, %v33_v23  ;;  %v160_v27 = vld [vmem:[%s375_s2] ss:$0 sm:$0xff]  ;;  %s249_s28 = scalar_lea.vmem %s153_s27, 128  ;;  %p254_p1 = scmp.lt.s32.totalorder %s153_s27, %s153_s27 }
   0xb   :  { %v124_v43 = vld [vmem:[%s376_s3] sm:$0xff]  ;;  %p250_p0 = scmp.ne.s32.totalorder %s153_s27, %s249_s28  ;;  %p255_p2 = scmp.lt.s32.totalorder %s249_s28, %s249_s28 }
   0xc   :  { %221 = vmatpush3.bf16.msra.mxu0 %v220_v10 }
   0xd   :  { %222 = vmatprep.subr.bf16.mxu0 %v273_v3  ;;  %p256_p3 = por %p255_p2, %p254_p1 }
   0xf   :  { %p257_p4 = pnand %p256_p3, %p250_p0 }
  0x10   :  { %224 = vmatpush3.bf16.msra.mxu0 %v223_v13 }
  0x11   :  { %225 = vmatprep.subr.bf16.mxu0 %v273_v3 }
  0x14   :  { %227 = vmatpush3.bf16.msra.mxu0 %v226_v16 }
  0x15   :  { %228 = vmatprep.subr.bf16.mxu0 %v273_v3 }
  0x18   :  { %230 = vmatpush3.bf16.msra.mxu0 %v229_v19 }
  0x19   :  { %231 = vmatprep.subr.bf16.mxu0 %v273_v3 }
  0x1c   :  { %233 = vmatpush3.bf16.msra.mxu0 %v232_v22 }
  0x1d   :  { %234 = vmatprep.subr.bf16.mxu0 %v273_v3 }
  0x20   :  { %236 = vmatpush3.bf16.msra.mxu0 %v235_v25 }
  0x23   :  { %211 = vmatmul.mubr.f32.vlgmr.msra.gmra.mrb[0].mxu0 %v18_v26 }
  0xf6   :  { %v108_v28 = vpop.f32.mrb[0].mxu0 }
  0xf7   :  { %v109_v29 = vadd.f32 %v160_v27, %v108_v28  ;;  %v212_v30 = vpop.f32.mrb[1].mxu0 }
  0xf9   :  { %v113_v31 = vand.u32 2147483647, %v109_v29  ;;  %v112_v37 = vmax.f32 %v109_v29, 0.0 }
  0xfb   :  { %v114_v32 = vsub.f32 0.0, %v113_v31 }
  0xfd   :  { %v115_v33 = vmul.f32 1.442695, %v114_v32 }
  0xff   :  { %243 = vpow2.f32 %v115_v33 }
 0x109   :  { %v244_v34 = vpop.eup %243 }
 0x10a   :  { %v117_v35 = vadd.f32 1.0, %v244_v34 }
 0x10c   :  { %245 = vlog2.f32 %v117_v35 }
 0x116   :  { %v246_v36 = vpop.eup %245 }
 0x117   :  { %v119_v38 = vmul.f32 0.6931472, %v246_v36 }
 0x119   :  { %v120_v39 = vadd.f32 %v119_v38, %v112_v37 }
 0x11b   :  { %136 = vrot.lane.b32.xlu1 %v120_v39, %s276_s0  ;;  %v121_v40 = vmul.f32 0.5, %v120_v39 }
 0x11d   :  { %v122_v41 = vmul.f32 1.442695, %v121_v40 }
 0x11f   :  { %247 = vpow2.f32 %v122_v41 }
 0x129   :  { %v248_v42 = vpop.eup %247 }
 0x12a   :  { %126 = vrot.lane.b32.xlu0 %v248_v42, %s277_s1 }
 0x12e   :  { %132 = vrot.lane.b32.xlu0 %v109_v29, %s276_s0 }
 0x18d   :  { %v137_v48 = vpop.permute.xlu1 %136 }
 0x19c   :  { %v127_v44 = vpop.permute.xlu0 %126 }
 0x19d   :  { %v129_v45 = vmul.f32 %v127_v44, %v124_v43 }
 0x19f   :  { %v130_v46 = vadd.f32 %v129_v45, %v109_v29 }
 0x1a0   :  { %v133_v47 = vpop.permute.xlu0 %132 }
 0x1a1   :  { %v140_v49 = vsel %vm139_vm1, %v130_v46, %v133_v47 }
 0x1a2   :  { %v142_v50 = vsel %vm141_vm2, %v140_v49, %v137_v48 }
 0x1a3   :  { %v144_v51 = vsel %vm143_vm3, %v142_v50, 0.0 }
 0x1a4   :  { %145 = vst [vmem:[#allocation2] sm:$0xff] %v144_v51 }
 0x1a5   :  { %260 = shalt.err (!%p257_p4)
}
 0x1a6   :  { %s261_s30 = scalar_lea.hbm %s377_s4, 128 }
 0x1a7   :  { %p262_p5 = scmp.ne.s32.totalorder %s377_s4, %s261_s30  ;;  %p265_p6 = scmp.lt.u32.totalorder %s261_s30, %s377_s4 }
 0x1a9   :  { %p267_p7 = pnand %p265_p6, %p262_p5 }
 0x1ab   :  { %270 = shalt.err (!%p267_p7)
}
 0x1ac   :  { %155 = dma.vmem_to_hbm [thread:$0]  %s153_s27, 128, %s377_s4, [#allocation3]  }
 0x1ad   :  { %271 = dma.done.wait [#allocation3], 128  }
 0x1ae   :  { %272 = vsyncadd [#allocation3], 4294967168 }
 0x1af   :  { %159 = vsyncpa [#allocation3], 1 }

</bundles_post_ra>
